<compile_context>
chip_gen: v5e
topology: v5e:2x2
jax: 0.10.0
libtpu: 0.0.40
codegen_flags: <defaults>
</compile_context>

<pallas_src>
import functools

import jax
import jax.numpy as jnp
from jax.experimental import pallas as pl
from jax.experimental.pallas import tpu as pltpu


def _round_up(x, m):
    return ((x + m - 1) // m) * m


def _pick_tile(size, align, max_tile):
    """Pick (tile, padded_size) for one axis.

    If the alignment-rounded size fits in a single tile, use it whole (no
    padding beyond alignment).  Otherwise choose the largest multiple-of-128
    tile <= max_tile whose total padding overhead stays within ~12.5%,
    falling back to 128 (which always achieves the minimum possible padding).
    """
    size_al = _round_up(size, align)
    if size_al <= max_tile:
        return size_al, size_al
    target = _round_up(size_al, 128)            # minimum achievable padded size
    for t in range(max_tile, 127, -128):        # multiples of 128, descending
        padded = _round_up(size_al, t)
        if padded * 8 <= target * 9:            # <= 12.5% padding overhead
            return t, padded
    return 128, target


# ---------------------------------------------------------------------------
# Kernel bodies
# ---------------------------------------------------------------------------
def _xty_kernel_f32(xt_ref, y_ref, o_ref):
    """One (i, j, k) step of (X^T) @ Y with the f32 output block itself acting
    as the accumulator (output BlockSpec returns the same (i, j) block for all
    k, so it stays VMEM-resident across the contraction axis)."""
    @pl.when(pl.program_id(2) == 0)
    def _():
        o_ref[...] = jnp.zeros_like(o_ref)

    # Standard (tn, tk) @ (tk, tm) contraction on the MXU -- no in-kernel
    # transpose, unlike the previous contract-dim-0 dot_general.
    o_ref[...] += jnp.dot(xt_ref[...], y_ref[...],
                          preferred_element_type=jnp.float32)


def _xty_kernel_acc(xt_ref, y_ref, o_ref, acc_ref):
    """Variant with a separate f32 accumulator, used when the output dtype is
    narrower than f32 (e.g. bf16 inputs -> bf16 outputs)."""
    k = pl.program_id(2)

    @pl.when(k == 0)
    def _():
        acc_ref[...] = jnp.zeros_like(acc_ref)

    acc_ref[...] += jnp.dot(xt_ref[...], y_ref[...],
                            preferred_element_type=jnp.float32)

    @pl.when(k == pl.num_programs(2) - 1)
    def _():
        o_ref[...] = acc_ref[...].astype(o_ref.dtype)


# ---------------------------------------------------------------------------
# pallas_call wrapper (operates on already-padded, tile-divisible inputs)
# ---------------------------------------------------------------------------
def _linear_kernel_padded(XTp, Yp, *, tn, tm, tk, out_dtype):
    Np, dp = XTp.shape
    _, Mp = Yp.shape
    grid = (Np // tn, Mp // tm, dp // tk)

    in_specs = [
        pl.BlockSpec((tn, tk), lambda i, j, k: (i, k)),   # X^T tile
        pl.BlockSpec((tk, tm), lambda i, j, k: (k, j)),   # Y tile
    ]
    out_specs = pl.BlockSpec((tn, tm), lambda i, j, k: (i, j))

    if out_dtype == jnp.float32:
        kernel = _xty_kernel_f32
        scratch_shapes = []
        acc_bytes = 0
    else:
        kernel = _xty_kernel_acc
        scratch_shapes = [pltpu.VMEM((tn, tm), jnp.float32)]
        acc_bytes = tn * tm * 4

    in_item = jnp.dtype(XTp.dtype).itemsize
    out_item = jnp.dtype(out_dtype).itemsize
    # Explicit double-buffered VMEM budget (+ slack) so the scoped-VMEM default
    # (16 MiB on v5e, 32 MiB on v6e/v7x) never constrains the larger tiles.
    vmem_bytes = (2 * tn * tm * out_item + acc_bytes
                  + 2 * tn * tk * in_item + 2 * tk * tm * in_item)
    vmem_limit = max(vmem_bytes + (4 << 20), 32 << 20)

    # TODO(synk): when dp*tn fits comfortably in VMEM, give X^T a full-d block
    # (index_map independent of j and k) and slice with pl.ds inside the kernel
    # to cut X HBM reads by a factor of Mp/tm in memory-bound regimes.
    return pl.pallas_call(
        kernel,
        out_shape=jax.ShapeDtypeStruct((Np, Mp), out_dtype),
        grid_spec=pltpu.PrefetchScalarGridSpec(
            num_scalar_prefetch=0,
            grid=grid,
            in_specs=in_specs,
            out_specs=out_specs,
            scratch_shapes=scratch_shapes,
        ),
        compiler_params=pltpu.CompilerParams(
            dimension_semantics=("parallel", "parallel", "arbitrary"),
            vmem_limit_bytes=vmem_limit,
        ),
    )(XTp, Yp)


# ---------------------------------------------------------------------------
# Public entry point — matches LinearKernel.forward semantics
# ---------------------------------------------------------------------------
@functools.partial(jax.jit,
                   static_argnames=("max_tile_nm", "max_tile_k", "compute_dtype"))
def linear_kernel(X, Y=None, *, max_tile_nm=None, max_tile_k=None,
                  compute_dtype=None):
    """Computes the N x M linear-kernel matrix K = X^T @ Y (Y defaults to X).

    X: (d, N), Y: (d, M) — same convention as the PyTorch LinearKernel module.

    max_tile_nm:   cap on the output tile sides (rounded to a multiple of 128;
                   default 1024).
    max_tile_k:    cap on the contraction tile (rounded to a multiple of 128;
                   default 512 for 4-byte inputs, 1024 for 2-byte inputs).
    compute_dtype: optional lower-precision MXU input dtype (e.g. jnp.bfloat16,
                   2-4x faster on all TPU gens); accumulation stays f32 and the
                   output keeps the original dtype.  Off by default so results
                   match the f32 reference.
    """
    if Y is None:
        # TODO(synk): symmetric (Gram) case could compute only upper-triangular
        # tiles via a scalar-prefetched (i, j) tile list and mirror K[j,i]=K[i,j].
        Y = X
    if X.ndim == 1:
        X = X[:, None]
    if Y.ndim == 1:
        Y = Y[:, None]
    d, N = X.shape
    d2, M = Y.shape
    if d != d2:
        raise ValueError("X and Y must share the feature dimension d")

    out_dtype = jnp.result_type(X.dtype, Y.dtype)
    in_dtype = jnp.dtype(compute_dtype) if compute_dtype is not None else out_dtype
    X = X.astype(in_dtype)
    Y = Y.astype(in_dtype)

    two_byte = jnp.dtype(in_dtype).itemsize <= 2
    if max_tile_nm is None:
        max_tile_nm = 1024
    if max_tile_k is None:
        max_tile_k = 1024 if two_byte else 512
    max_tile_nm = max(128, (max_tile_nm // 128) * 128)   # keep output lane-dense
    max_tile_k = max(128, (max_tile_k // 128) * 128)

    sub = 16 if two_byte else 8          # sublane pack for the input dtype

    # N (sublane axis of X^T / output) and M (lane axis of Y / output).
    tn, Np = _pick_tile(N, sub, max_tile_nm)
    tm, Mp = _pick_tile(M, 128, max_tile_nm)

    # Keep >= 2 parallel tiles when the problem is big enough so v7x's two
    # TensorCores both get work under ("parallel", "parallel", "arbitrary").
    if (Np // tn) * (Mp // tm) == 1:
        if Np >= 256:
            tn = _round_up((Np + 1) // 2, sub)
            Np = 2 * tn
        elif Mp >= 256:
            tm = _round_up((Mp + 1) // 2, 128)
            Mp = 2 * tm

    # Contraction axis: single full-d tile when it fits (only sublane-pack
    # alignment), otherwise 128-aligned tiles (lane dim of the X^T block).
    d_al = _round_up(d, sub)
    if d_al <= max_tile_k:
        tk, dp = d_al, d_al
    else:
        tk, dp = _pick_tile(d, 128, max_tile_k)

    # Transpose X once (one amortized HBM pass) so the kernel is a standard
    # contract-last-dim matmul; pad only the axes that actually need it
    # (zeros are inert under X^T Y) and crop at the end.
    XT = X.T                                            # (N, d)
    if (Np, dp) != (N, d):
        XT = jnp.pad(XT, ((0, Np - N), (0, dp - d)))
    if (dp, Mp) != (d, M):
        Y = jnp.pad(Y, ((0, dp - d), (0, Mp - M)))

    out = _linear_kernel_padded(XT, Y, tn=tn, tm=tm, tk=tk, out_dtype=out_dtype)
    if (Np, Mp) != (N, M):
        out = out[:N, :M]
    return out


if __name__ == "__main__":
    key = jax.random.PRNGKey(0)
    kx, ky, ka, kb = jax.random.split(key, 4)

    # --- Small case matching the module's d x N / d x M convention --------
    d, N, M = 32, 16, 8
    X = jax.random.normal(kx, (d, N), dtype=jnp.float32)
    Y = jax.random.normal(ky, (d, M), dtype=jnp.float32)

    K_xy = linear_kernel(X, Y)
    jax.block_until_ready(K_xy)
    assert K_xy.shape == (N, M)
    assert jnp.allclose(K_xy, X.T @ Y, atol=1e-5, rtol=1e-5)

    # Y defaults to X (Gram matrix)
    K_xx = linear_kernel(X)
    jax.block_until_ready(K_xx)
    assert K_xx.shape == (N, N)
    assert jnp.allclose(K_xx, X.T @ X, atol=1e-5, rtol=1e-5)

    # --- Moderate case exercising the tiled 3-D grid, k accumulation and
    #     padding/crop (M=192 is not a multiple of 128) --------------------
    d2_, N2, M2 = 384, 256, 192
    A = jax.random.normal(ka, (d2_, N2), dtype=jnp.float32)
    B = jax.random.normal(kb, (d2_, M2), dtype=jnp.float32)
    K_ab = linear_kernel(A, B, max_tile_nm=128, max_tile_k=128)   # grid (2,2,3)
    jax.block_until_ready(K_ab)
    assert K_ab.shape == (N2, M2)
    assert jnp.allclose(K_ab, A.T @ B, atol=1e-4, rtol=1e-5)

    # --- bf16 inputs exercise the scratch-accumulator kernel variant ------
    A16, B16 = A.astype(jnp.bfloat16), B.astype(jnp.bfloat16)
    K16 = linear_kernel(A16, B16)
    jax.block_until_ready(K16)
    ref16 = A16.astype(jnp.float32).T @ B16.astype(jnp.float32)
    assert K16.dtype == jnp.bfloat16
    assert jnp.allclose(K16.astype(jnp.float32), ref16, atol=0.5, rtol=5e-2)

    print("KERNEL_OK")
</pallas_src>

<mosaic_0001>
module attributes {stable_mosaic.version = 11 : i64} {
  func.func @_xty_kernel_f32(%arg0: i32, %arg1: i32, %arg2: i32, %arg3: memref<16x32xf32, #tpu.memory_space<vmem>>, %arg4: memref<32x128xf32, #tpu.memory_space<vmem>>, %arg5: memref<16x128xf32, #tpu.memory_space<vmem>>) attributes {dimension_semantics = [#tpu.dimension_semantics<parallel>, #tpu.dimension_semantics<parallel>, #tpu.dimension_semantics<arbitrary>], iteration_bounds = array<i64: 1, 1, 1>, scalar_prefetch = 0 : i64, scratch_operands = 0 : i64, tpu.core_type = #tpu.core_type<tc>, window_params = [{transform_indices = @transform_0, window_bounds = array<i64: 16, 32>}, {transform_indices = @transform_1, window_bounds = array<i64: 32, 128>}, {transform_indices = @transform_2, window_bounds = array<i64: 16, 128>}]} {
    %c0_i32 = arith.constant 0 : i32
    %0 = arith.cmpi eq, %arg2, %c0_i32 : i32
    %1 = arith.extui %0 : i1 to i32
    %c0_i32_0 = arith.constant 0 : i32
    %2 = arith.cmpi ne, %1, %c0_i32_0 : i32
    scf.if %2 {
      %cst_8 = arith.constant 0.000000e+00 : f32
      %9 = vector.broadcast %cst_8 : f32 to vector<16x128xf32>
      %c0_9 = arith.constant 0 : index
      %c0_10 = arith.constant 0 : index
      %10 = vector.load %arg5[%c0_9, %c0_10] : memref<16x128xf32, #tpu.memory_space<vmem>>, vector<16x128xf32>
      tpu.vector_store %arg5[%c0_9, %c0_10], %9 {strides = array<i32>} : memref<16x128xf32, #tpu.memory_space<vmem>>, vector<16x128xf32>,
    } else {
    }
    %c0 = arith.constant 0 : index
    %c0_1 = arith.constant 0 : index
    %3 = vector.load %arg5[%c0, %c0_1] : memref<16x128xf32, #tpu.memory_space<vmem>>, vector<16x128xf32>
    %c0_2 = arith.constant 0 : index
    %c0_3 = arith.constant 0 : index
    %4 = vector.load %arg3[%c0_2, %c0_3] : memref<16x32xf32, #tpu.memory_space<vmem>>, vector<16x32xf32>
    %c0_4 = arith.constant 0 : index
    %c0_5 = arith.constant 0 : index
    %5 = vector.load %arg4[%c0_4, %c0_5] : memref<32x128xf32, #tpu.memory_space<vmem>>, vector<32x128xf32>
    %cst = arith.constant dense<0.000000e+00> : vector<16x128xf32>
    %6 = tpu.matmul %4, %5, %cst {dimension_numbers = #tpu.dot_dimension_numbers<[1], [0], [0], [1], [0, 0, 1, 1], [], []>} : vector<16x32xf32>, vector<32x128xf32>, vector<16x128xf32> -> vector<16x128xf32>
    %7 = arith.addf %3, %6 : vector<16x128xf32>
    %c0_6 = arith.constant 0 : index
    %c0_7 = arith.constant 0 : index
    %8 = vector.load %arg5[%c0_6, %c0_7] : memref<16x128xf32, #tpu.memory_space<vmem>>, vector<16x128xf32>
    tpu.vector_store %arg5[%c0_6, %c0_7], %7 {strides = array<i32>} : memref<16x128xf32, #tpu.memory_space<vmem>>, vector<16x128xf32>,
    return
  }
  func.func @transform_0(%arg0: i32, %arg1: i32, %arg2: i32) -> (i32, i32) {
    %c0_i32 = arith.constant 0 : i32
    return %arg0, %arg2 : i32, i32
  }
  func.func @transform_1(%arg0: i32, %arg1: i32, %arg2: i32) -> (i32, i32) {
    %c0_i32 = arith.constant 0 : i32
    return %arg2, %arg1 : i32, i32
  }
  func.func @transform_2(%arg0: i32, %arg1: i32, %arg2: i32) -> (i32, i32) {
    %c0_i32 = arith.constant 0 : i32
    return %arg0, %arg1 : i32, i32
  }
}

</mosaic_0001>

<bundles_post_ra>
// kernel: linear_kernel.1
= control target key start
LH: loop header
LB: loop body
LE: loop exit
PB: predicated region body
PF: predicated region fallthrough
CT: control target
= control target key end

     0   :  { %vm25_vm0 = vcmask 261120   ;;  %s109_s1 = inlined_call_operand.vmem [shape: f32[32,128], index: 1, kind: input, shape index: {}]   ;;  %s110_s0 = inlined_call_operand.vmem [shape: f32[16,32], index: 0, kind: input, shape index: {}]   ;;  %s111_s2 = inlined_call_operand.vmem [shape: f32[16,128], index: 2, kind: output, shape index: {}]  }
   0x1   :  { %v24_v0 = vld [vmem:[%s109_s1 + $0x18] sm:$0xff]  ;;  %v23_v1 = vld [vmem:[%s109_s1 + $0x10] sm:$0xff]  ;;  %v22_v2 = vld [vmem:[%s109_s1 + $0x8] sm:$0xff] }
   0x2   :  { %44 = vmatpush.msra.mxu0 %v24_v0  ;;  %65 = vmatpush.msra.mxu1 %v24_v0  ;;  %v21_v3 = vld [vmem:[%s109_s1] sm:$0xff]  ;;  %v20_v5 = vld [vmem:[%s110_s0 + $0x8] sm:$0xff] }
   0x3   :  { %v19_v4 = vld [vmem:[%s110_s0] sm:$0xff] }
   0x4   :  { %45 = vmatpush.msra.mxu0 %v23_v1  ;;  %66 = vmatpush.msra.mxu1 %v23_v1 }
   0x6   :  { %46 = vmatpush.msra.mxu0 %v22_v2  ;;  %67 = vmatpush.msra.mxu1 %v22_v2 }
   0x8   :  { %47 = vmatpush.msra.mxu0 %v21_v3  ;;  %68 = vmatpush.msra.mxu1 %v21_v3 }
   0x9   :  { %63 = vmatmul.msk.f32.vlgmr.msra.gmra.mxu0 %vm25_vm0, %v19_v4  ;;  %64 = vmatmul.msk.f32.vlgmr.msra.gmra.mxu1 %vm25_vm0, %v20_v5 }
  0x86   :  { %v49_v6 = vpop.f32.mrf.mxu0  ;;  %v52_v7 = vpop.f32.mrf.mxu1 }
  0x87   :  { %57 = vst [vmem:[%s111_s2] sm:$0xff] %v49_v6 }
  0x88   :  { %58 = vst [vmem:[%s111_s2 + $0x8] sm:$0xff] %v52_v7 }

</bundles_post_ra>
